<compile_context>
chip_gen: v5e
topology: v5e:2x2
jax: 0.10.0
libtpu: 0.0.40
codegen_flags: <defaults>
</compile_context>

<pallas_src>
from functools import partial

import jax
import jax.numpy as jnp
from jax import lax
from jax.experimental import pallas as pl
from jax.experimental.pallas import tpu as pltpu


def _round_up(x, m):
    return ((x + m - 1) // m) * m


def _matchshifted_kernel(shift, left_ref, right_ref, out_ref):
    # left_ref, right_ref: (TC, H, W)   out_ref: (2, TC, H, W)
    tc, h, w = left_ref.shape
    left = left_ref[...]
    right = right_ref[...]

    if shift <= 0:
        # Static no-op shift: straight copy.
        out_ref[0] = left
        out_ref[1] = right
    elif shift >= w:
        # Static degenerate case: every column is masked away.
        out_ref[0] = jnp.zeros_like(left)
        out_ref[1] = jnp.zeros_like(right)
    else:
        col = lax.broadcasted_iota(jnp.int32, (tc, h, w), dimension=2)
        keep = col >= shift                     # zero out the first `shift` columns
        zeros = jnp.zeros_like(left)

        out_ref[0] = jnp.where(keep, left, zeros)

        # shifted_right[..., x] = right[..., x - shift] for x >= shift;
        # roll toward higher indices then mask (wrapped values land in the
        # masked region, so only the roll direction matters).
        rolled = pltpu.roll(right, shift, axis=2)
        out_ref[1] = jnp.where(keep, rolled, zeros)


def matchshifted(left, right, shift, *, max_block_planes=None,
                 vmem_limit_bytes=48 * 1024 * 1024):
    """left, right: (B, C, H, W); shift: static Python int. Returns (B, 2C, 1, H, W)."""
    assert left.shape == right.shape and left.dtype == right.dtype
    B, C, H, W = left.shape
    shift = max(0, int(shift))
    itemsize = jnp.dtype(left.dtype).itemsize

    # VMEM footprint of one (H, W) plane after (sublane, lane) padding:
    # lanes pad to 128, sublanes to 8 (f32) / 16 (bf16) / 32 (int8).
    sublane = 8 * max(1, 4 // itemsize)
    plane_pad_bytes = _round_up(H, sublane) * _round_up(W, 128) * itemsize

    # Target ~2 MiB per input block.  Per grid step: left + right + 2x output,
    # double buffered => ~8x the input block (~16 MiB), under the 48 MiB limit.
    target_block_bytes = 2 * 1024 * 1024
    tc = max(1, target_block_bytes // plane_pad_bytes)
    if max_block_planes is not None:
        tc = min(tc, int(max_block_planes))
    TC = int(min(C, tc))

    grid = (B, pl.cdiv(C, TC))

    # Pure-bandwidth op: read left + right, write 2x that.
    bytes_accessed = 4 * B * C * H * W * itemsize

    out5 = pl.pallas_call(
        partial(_matchshifted_kernel, shift),
        out_shape=jax.ShapeDtypeStruct((B, 2, C, H, W), left.dtype),
        grid=grid,
        in_specs=[
            pl.BlockSpec((None, TC, H, W), lambda b, c: (b, c, 0, 0)),
            pl.BlockSpec((None, TC, H, W), lambda b, c: (b, c, 0, 0)),
        ],
        out_specs=pl.BlockSpec((None, 2, TC, H, W), lambda b, c: (b, 0, c, 0, 0)),
        compiler_params=pltpu.CompilerParams(
            dimension_semantics=("parallel", "parallel"),
            vmem_limit_bytes=vmem_limit_bytes,
        ),
        cost_estimate=pl.CostEstimate(
            flops=0, transcendentals=0, bytes_accessed=bytes_accessed),
    )(left, right)

    # (B, 2, C, H, W) -> (B, 2C, 1, H, W): left channels first, then right
    # channels, matching torch.cat(..., dim=1).  Pure reshape => free.
    return out5.reshape(B, 2 * C, 1, H, W)


def _reference(left, right, shift):
    B, C, H, W = left.shape
    sl = jnp.pad(left[:, :, :, shift:], ((0, 0), (0, 0), (0, 0), (shift, 0)))
    sr = jnp.pad(right[:, :, :, : W - shift], ((0, 0), (0, 0), (0, 0), (shift, 0)))
    return jnp.concatenate([sl, sr], axis=1).reshape(B, 2 * C, 1, H, W)


if __name__ == "__main__":
    key = jax.random.PRNGKey(0)
    k1, k2, k3, k4 = jax.random.split(key, 4)

    # Test 1: shapes implied by the module spec.
    B, C, H, W = 2, 4, 16, 16
    shift = 3
    left = jax.random.normal(k1, (B, C, H, W), dtype=jnp.float32)
    right = jax.random.normal(k2, (B, C, H, W), dtype=jnp.float32)
    out = jax.block_until_ready(matchshifted(left, right, shift))
    assert out.shape == (B, 2 * C, 1, H, W)
    assert jnp.allclose(out, _reference(left, right, shift)), "test1 mismatch vs reference"

    # Test 2: multi-block channel grid (ragged last block) + different shift.
    B2, C2, H2, W2, shift2 = 2, 8, 8, 16, 5
    left2 = jax.random.normal(k3, (B2, C2, H2, W2), dtype=jnp.float32)
    right2 = jax.random.normal(k4, (B2, C2, H2, W2), dtype=jnp.float32)
    out2 = jax.block_until_ready(
        matchshifted(left2, right2, shift2, max_block_planes=3))
    assert out2.shape == (B2, 2 * C2, 1, H2, W2)
    assert jnp.allclose(out2, _reference(left2, right2, shift2)), "test2 mismatch vs reference"

    print("KERNEL_OK")
</pallas_src>

<mosaic_0001>
module attributes {stable_mosaic.version = 11 : i64} {
  func.func @_matchshifted_kernel(%arg0: i32, %arg1: i32, %arg2: memref<1x4x16x16xf32, #tpu.memory_space<vmem>>, %arg3: memref<1x4x16x16xf32, #tpu.memory_space<vmem>>, %arg4: memref<1x2x4x16x16xf32, #tpu.memory_space<vmem>>) attributes {dimension_semantics = [#tpu.dimension_semantics<parallel>, #tpu.dimension_semantics<parallel>], iteration_bounds = array<i64: 2, 1>, scalar_prefetch = 0 : i64, scratch_operands = 0 : i64, tpu.core_type = #tpu.core_type<tc>, window_params = [{transform_indices = @transform_0, window_bounds = array<i64: 1, 4, 16, 16>}, {transform_indices = @transform_1, window_bounds = array<i64: 1, 4, 16, 16>}, {transform_indices = @transform_2, window_bounds = array<i64: 1, 2, 4, 16, 16>}]} {
    %c0 = arith.constant 0 : index
    %c0_0 = arith.constant 0 : index
    %c0_1 = arith.constant 0 : index
    %c0_2 = arith.constant 0 : index
    %0 = vector.load %arg2[%c0, %c0_0, %c0_1, %c0_2] : memref<1x4x16x16xf32, #tpu.memory_space<vmem>>, vector<1x4x16x16xf32>
    %1 = vector.shape_cast %0 : vector<1x4x16x16xf32> to vector<4x16x16xf32>
    %c0_3 = arith.constant 0 : index
    %c0_4 = arith.constant 0 : index
    %c0_5 = arith.constant 0 : index
    %c0_6 = arith.constant 0 : index
    %2 = vector.load %arg3[%c0_3, %c0_4, %c0_5, %c0_6] : memref<1x4x16x16xf32, #tpu.memory_space<vmem>>, vector<1x4x16x16xf32>
    %3 = vector.shape_cast %2 : vector<1x4x16x16xf32> to vector<4x16x16xf32>
    %4 = tpu.iota {dimensions = array<i32: 2>} : vector<4x16x16xi32>
    %c3_i32 = arith.constant 3 : i32
    %5 = vector.broadcast %c3_i32 : i32 to vector<4x16x16xi32>
    %6 = arith.cmpi sge, %4, %5 : vector<4x16x16xi32>
    %cst = arith.constant 0.000000e+00 : f32
    %7 = vector.broadcast %cst : f32 to vector<4x16x16xf32>
    %8 = arith.select %6, %1, %7 : vector<4x16x16xi1>, vector<4x16x16xf32>
    %c0_7 = arith.constant 0 : index
    %c0_8 = arith.constant 0 : index
    %c0_9 = arith.constant 0 : index
    %c0_10 = arith.constant 0 : index
    %c0_11 = arith.constant 0 : index
    %9 = vector.load %arg4[%c0_7, %c0_8, %c0_9, %c0_10, %c0_11] : memref<1x2x4x16x16xf32, #tpu.memory_space<vmem>>, vector<1x1x4x16x16xf32>
    %10 = vector.shape_cast %9 : vector<1x1x4x16x16xf32> to vector<4x16x16xf32>
    %11 = vector.shape_cast %8 : vector<4x16x16xf32> to vector<1x1x4x16x16xf32>
    tpu.vector_store %arg4[%c0_7, %c0_8, %c0_9, %c0_10, %c0_11], %11 {strides = array<i32>} : memref<1x2x4x16x16xf32, #tpu.memory_space<vmem>>, vector<1x1x4x16x16xf32>,
    %c3_i32_12 = arith.constant 3 : i32
    %12 = tpu.dynamic_rotate %3 by %c3_i32_12 dim 2 : vector<4x16x16xf32>, i32 -> vector<4x16x16xf32>
    %13 = arith.select %6, %12, %7 : vector<4x16x16xi1>, vector<4x16x16xf32>
    %c0_13 = arith.constant 0 : index
    %c1 = arith.constant 1 : index
    %c0_14 = arith.constant 0 : index
    %c0_15 = arith.constant 0 : index
    %c0_16 = arith.constant 0 : index
    %14 = vector.load %arg4[%c0_13, %c1, %c0_14, %c0_15, %c0_16] : memref<1x2x4x16x16xf32, #tpu.memory_space<vmem>>, vector<1x1x4x16x16xf32>
    %15 = vector.shape_cast %14 : vector<1x1x4x16x16xf32> to vector<4x16x16xf32>
    %16 = vector.shape_cast %13 : vector<4x16x16xf32> to vector<1x1x4x16x16xf32>
    tpu.vector_store %arg4[%c0_13, %c1, %c0_14, %c0_15, %c0_16], %16 {strides = array<i32>} : memref<1x2x4x16x16xf32, #tpu.memory_space<vmem>>, vector<1x1x4x16x16xf32>,
    return
  }
  func.func @transform_0(%arg0: i32, %arg1: i32) -> (i32, i32, i32, i32) {
    %c0_i32 = arith.constant 0 : i32
    %c0_i32_0 = arith.constant 0 : i32
    %c0_i32_1 = arith.constant 0 : i32
    return %arg0, %arg1, %c0_i32, %c0_i32_0 : i32, i32, i32, i32
  }
  func.func @transform_1(%arg0: i32, %arg1: i32) -> (i32, i32, i32, i32) {
    %c0_i32 = arith.constant 0 : i32
    %c0_i32_0 = arith.constant 0 : i32
    %c0_i32_1 = arith.constant 0 : i32
    return %arg0, %arg1, %c0_i32, %c0_i32_0 : i32, i32, i32, i32
  }
  func.func @transform_2(%arg0: i32, %arg1: i32) -> (i32, i32, i32, i32, i32) {
    %c0_i32 = arith.constant 0 : i32
    %c0_i32_0 = arith.constant 0 : i32
    %c0_i32_1 = arith.constant 0 : i32
    %c0_i32_2 = arith.constant 0 : i32
    return %arg0, %c0_i32, %arg1, %c0_i32_0, %c0_i32_1 : i32, i32, i32, i32, i32
  }
}

</mosaic_0001>

<bundles_post_ra>
// kernel: tpu_custom_call.1
= control target key start
LH: loop header
LB: loop body
LE: loop exit
PB: predicated region body
PF: predicated region fallthrough
CT: control target
= control target key end

     0   :  { %7 = vsyncpa [#allocation3], 0  ;;  %s1006_s0 = inlined_call_operand.hbm [shape: f32[2,4,16,16], index: 0, kind: input, shape index: {}]   ;;  %s1007_s1 = inlined_call_operand.hbm [shape: f32[2,4,16,16], index: 1, kind: input, shape index: {}]   ;;  %s1008_s2 = inlined_call_operand.hbm [shape: f32[2,2,4,16,16], index: 2, kind: output, shape index: {}]  }
   0x1   :  { %9 = vsyncpa [#allocation3 + $0x1], 0 }
   0x2   :  { %10 = vsyncpa [#allocation6], 0 }
   0x3   :  { %12 = vsyncpa [#allocation6 + $0x1], 0 }
   0x4   :  { %13 = vsyncpa [#allocation4], 0 }
   0x5   :  { %15 = vsyncpa [#allocation4 + $0x1], 0  ;;  %s771_s9 = smov 0   ;;  %s773_s10 = smov 0  }
   0x6   :  { %s775_s11 = smov 0   ;;  %s777_s12 = smov 0  }
   0x7   :  { %s779_s13 = smov 0   ;;  %s781_s14 = smov 0  }
   0x8 LB: > { %s499_s15 = sadd.s32 4294967295, %s748_s14   ;;  %s500_s16 = sadd.s32 4294967294, %s748_s14   ;;  %s748_s14 = sphi %s781_s14, %s21_s14   ;;  %s744_s13 = sphi %s779_s13, %s1018_s13   ;;  %s740_s12 = sphi %s777_s12, %s1017_s12   ;;  %s736_s11 = sphi %s775_s11, %s1016_s11   ;;  %s732_s10 = sphi %s773_s10, %s1015_s10   ;;  %s728_s9 = sphi %s771_s9, %s1014_s9  }
   0x9   : > { %s33_s17 = sadd.s32 1, %s744_s13  ;;  %s42_s18 = sadd.s32 1, %s736_s11 }
   0xa   : > { %p35_p0 = scmp.ge.s32.totalorder %s33_s17, 2  ;;  %p49_p1 = scmp.ne.s32.totalorder %s736_s11, %s732_s10 }
   0xb   : > { %p50_p2 = scmp.eq.s32.totalorder %s748_s14, 0  ;;  %p55_p3 = scmp.ne.s32.totalorder %s732_s10, %s728_s9 }
   0xc   : > { %s1020_s17 = smov (%p35_p0, %s33_s17), 0  ;;  %p56_p5 = scmp.eq.s32.totalorder %s499_s15, 0 }
   0xd   : > { %p812_p4 = por %p50_p2, %p49_p1  ;;  %s37_s20 = ssub.s32 %s744_s13, %s1020_s17 }
   0xe   : > { %p109_p6 = scmp.eq.s32.totalorder %s499_s15, 1  ;;  %p40_p7 = scmp.eq.s32.totalorder %s37_s20, 0 }
   0xf   : > { %p818_p8 = por %p56_p5, %p55_p3  ;;  %p115_p10 = scmp.eq.s32.totalorder %s500_s16, 1 }
  0x10   : > { %p822_p9 = por %p109_p6, %p49_p1  ;;  %p502_p12 = scmp.ge.s32.totalorder %s748_s14, 2 }
  0x11   : > { %s827_s23 = scalar_select %p40_p7, %s736_s11, %s42_s18  }
  0x12   : > { %p829_p11 = por %p115_p10, %p55_p3  ;;  %p546_p13 = scmp.lt.s32.totalorder %s748_s14, 2 }
  0x13   : > { %s836_s25 = sand.u32 1, %s736_s11   ;;  %s526_s27 = sshll.u32 %s744_s13, 6 }
  0x14   : > { %s503_s26 = sshll.u32 %s836_s25, 6  ;;  %s147_s30 = scalar_lea.hbm %s1006_s0, %s526_s27 }
  0x15   : > { %s139_s3 = scalar_lea.vmem [#allocation2], %s503_s26  ;;  %s148_s5 = sshll.u32 %s147_s30, 4  ;;  %s149_s5 = int_to_ptr.hbm [resolvable:$true] %s148_s5 }
  0x16   : > { %s150_s4 = sshll.u32 %s139_s3, 4  ;;  %p845_p0 = pnand %p546_p13, %p812_p4  ;;  %s151_s4 = int_to_ptr.vmem [resolvable:$true] %s150_s4 }
  0x17   : > { %p509_p1 = scmp.ge.s32.totalorder %s748_s14, 1  ;;  %s136_s7 = scalar_lea.sflag [#allocation3], %s836_s25 }
  0x18   : > { %s750_s8 = smov 128   ;;  %s751_s15 = smov 8  }
  0x19   : > { %538 = dma.hbm_to_vmem [thread:$0]  (!%p845_p0), %s149_s5, 1024, %s151_s4, %s136_s7, %s750_s8, %s750_s8, %s751_s15  }
  0x1a   : > { %p183_p2 = scmp.lt.s32.totalorder %s748_s14, 3  ;;  %s172_s20 = scalar_lea.hbm %s1007_s1, %s526_s27 }
  0x1b   : > { %s173_s28 = sshll.u32 %s172_s20, 4  ;;  %s164_s19 = scalar_lea.vmem [#allocation5], %s503_s26  ;;  %s174_s28 = int_to_ptr.hbm [resolvable:$true] %s173_s28 }
  0x1c   : > { %p184_p3 = pnand %p509_p1, %p183_p2  ;;  %s175_s29 = sshll.u32 %s164_s19, 4  ;;  %s176_s29 = int_to_ptr.vmem [resolvable:$true] %s175_s29 }
  0x1d   : > { %s161_s30 = scalar_lea.sflag [#allocation6], %s836_s25  ;;  %s861_s3 = sand.u32 (!%p184_p3), 1, %s732_s10  }
  0x1e   : > { %541 = dma.hbm_to_vmem [thread:$0]  (!%p845_p0), %s174_s28, 1024, %s176_s29, %s161_s30, %s750_s8, %s750_s8, %s751_s15  }
  0x1f   : > { %187 = sbr.rel (%p184_p3) target bundleno = 400 (0x190), region = 28  ;;  %s510_s4 = sshll.u32 (!%p184_p3), %s861_s3, 6 }
  0x20   : > { %s190_s5 = scalar_lea.sflag (!%p184_p3), [#allocation3], %s861_s3  ;;  %s865_s7 = scalar_lea.vmem (!%p184_p3), [#allocation2], %s510_s4 }
  0x24   : > { %715 = dma.done.wait (%p818_p8), %s190_s5, 1024  }
  0x25   : > { %717 = vsyncadd (%p818_p8), %s190_s5, 4294966272  ;;  %s200_s25 = scalar_lea.sflag [#allocation6], %s861_s3  ;;  %s203_s26 = scalar_lea.vmem [#allocation5], %s510_s4 }
  0x26   : > { %719 = dma.done.wait (%p818_p8), %s200_s25, 1024  }
  0x27   : > { %721 = vsyncadd (%p818_p8), %s200_s25, 4294966272  ;;  %v243_v0 = vld [vmem:[%s203_s26 + $0x10] sm:$0xff]  ;;  %v241_v1 = vld [vmem:[%s203_s26] sm:$0xff]  ;;  %s752_s27 = smov 16   ;;  %vm269_vm0 = vcmask 1047680   ;;  %s753_s21 = smov 115   ;;  %v249_v40 = vlaneseq }
  0x28   : > { %276 = vrot.lane.b32.xlu1 %v243_v0, %s752_s27  ;;  %270 = vrot.lane.b32.xlu0 %v241_v1, %s752_s27  ;;  %v245_v2 = vld [vmem:[%s203_s26 + $0x20] sm:$0xff]  ;;  %v242_v3 = vld [vmem:[%s203_s26 + $0x8] sm:$0xff]  ;;  %s512_s6 = sshll.u32 %s861_s3, 7  ;;  %vm260_vm2 = vcmask 130048   ;;  %s528_s15 = sshll.u32 %s740_s12, 7 }
  0x29   : > { %282 = vrot.lane.b32.xlu2 %v245_v2, %s752_s27  ;;  %v244_v4 = vld [vmem:[%s203_s26 + $0x18] sm:$0xff]  ;;  %v246_v5 = vld [vmem:[%s203_s26 + $0x28] sm:$0xff]  ;;  %v247_v7 = vld [vmem:[%s203_s26 + $0x30] sm:$0xff]  ;;  %v250_v41 = vand.u32 127, %v249_v40  ;;  %s917_s8 = scalar_lea.vmem [#allocation7], %s512_s6  ;;  %s382_s20 = scalar_lea.hbm %s1008_s2, %s528_s15 }
  0x2a   : > { %v248_v6 = vld [vmem:[%s203_s26 + $0x38] sm:$0xff]  ;;  %v233_v43 = vld [vmem:[%s865_s7] sm:$0xff]  ;;  %v234_v44 = vld [vmem:[%s865_s7 + $0x8] sm:$0xff]  ;;  %s383_s28 = sshll.u32 %s917_s8, 4  ;;  %s385_s19 = sshll.u32 %s382_s20, 4  ;;  %s384_s28 = int_to_ptr.vmem [resolvable:$true] %s383_s28  ;;  %s386_s19 = int_to_ptr.hbm [resolvable:$true] %s385_s19 }
  0x2b   : > { %vm251_vm1 = vcmp.ge.s32.totalorder %v250_v41, 3  ;;  %v235_v45 = vld [vmem:[%s865_s7 + $0x10] sm:$0xff]  ;;  %v236_v47 = vld [vmem:[%s865_s7 + $0x18] sm:$0xff]  ;;  %v237_v48 = vld [vmem:[%s865_s7 + $0x20] sm:$0xff]  ;;  %s368_s12 = scalar_lea.sflag [#allocation4], %s861_s3  ;;  %s676_s29 = sshra.s32 %s386_s19, 4  ;;  %s677_s29 = int_to_ptr.hbm [resolvable:$true] %s676_s29 }
  0x2c   : > { %v252_v49 = vsel %vm251_vm1, %v233_v43, 0.0  ;;  %v253_v50 = vsel %vm251_vm1, %v234_v44, 0.0  ;;  %v238_v51 = vld [vmem:[%s865_s7 + $0x28] sm:$0xff]  ;;  %v254_v52 = vsel %vm251_vm1, %v235_v45, 0.0  ;;  %v239_v53 = vld [vmem:[%s865_s7 + $0x30] sm:$0xff]  ;;  %v255_v54 = vsel %vm251_vm1, %v236_v47, 0.0  ;;  %p683_p7 = scmp.lt.s32.totalorder %s677_s29, %s1008_s2 }
  0x2d   : > { %261 = vst.msk [vmem:[%s917_s8] sm:$0xff] %vm260_vm2, %v252_v49  ;;  %v256_v55 = vsel %vm251_vm1, %v237_v48, 0.0  ;;  %v257_v56 = vsel %vm251_vm1, %v238_v51, 0.0  ;;  %v240_v57 = vld [vmem:[%s865_s7 + $0x38] sm:$0xff]  ;;  %v258_v58 = vsel %vm251_vm1, %v239_v53, 0.0  ;;  %s678_s30 = scalar_lea.hbm %s677_s29, 128 }
  0x2e   : > { %262 = vst.msk [vmem:[%s917_s8 + $0x8] sm:$0xff] %vm260_vm2, %v253_v50  ;;  %v259_v62 = vsel %vm251_vm1, %v240_v57, 0.0  ;;  %p679_p4 = scmp.ne.s32.totalorder %s677_s29, %s678_s30  ;;  %s682_s7 = scalar_lea.hbm %s1008_s2, 256 }
  0x2f   : > { %263 = vst.msk [vmem:[%s917_s8 + $0x10] sm:$0xff] %vm260_vm2, %v254_v52  ;;  %p684_p8 = scmp.lt.s32.totalorder %s682_s7, %s678_s30 }
  0x30   : > { %273 = vrot.lane.b32.xlu0 %v242_v3, %s752_s27  ;;  %279 = vrot.lane.b32.xlu1 %v244_v4, %s752_s27  ;;  %264 = vst.msk [vmem:[%s917_s8 + $0x18] sm:$0xff] %vm260_vm2, %v255_v54  ;;  %p680_p5 = pnand %p679_p4, %p822_p9 }
  0x31   : > { %285 = vrot.lane.b32.xlu2 %v246_v5, %s752_s27  ;;  %265 = vst.msk [vmem:[%s917_s8 + $0x20] sm:$0xff] %vm260_vm2, %v256_v55  ;;  %p685_p10 = por %p684_p8, %p683_p7 }
  0x32   : > { %266 = vst.msk [vmem:[%s917_s8 + $0x28] sm:$0xff] %vm260_vm2, %v257_v56  ;;  %p681_p6 = pneg %p680_p5 }
  0x33   : > { %267 = vst.msk [vmem:[%s917_s8 + $0x30] sm:$0xff] %vm260_vm2, %v258_v58 }
  0x34   : > { %268 = vst.msk [vmem:[%s917_s8 + $0x38] sm:$0xff] %vm260_vm2, %v259_v62  ;;  %p686_p13 = pnand %p685_p10, %p681_p6 }
  0x38   : > { %291 = vrot.lane.b32.xlu1 %v248_v6, %s752_s27  ;;  %288 = vrot.lane.b32.xlu0 %v247_v7, %s752_s27 }
  0x83   : > { %v283_v8 = vpop.permute.xlu2 %282 }
  0x84   : > { %v284_v20 = vsel %vm269_vm0, %v283_v8, %v245_v2 }
  0x8b   : > { %v286_v13 = vpop.permute.xlu2 %285 }
  0x8c   : > { %v287_v14 = vsel %vm269_vm0, %v286_v13, %v246_v5 }
  0x9a   : > { %v277_v9 = vpop.permute.xlu1 %276  ;;  %v271_v10 = vpop.permute.xlu0 %270 }
  0x9b   : > { %v278_v11 = vsel %vm269_vm0, %v277_v9, %v243_v0  ;;  %v272_v12 = vsel %vm269_vm0, %v271_v10, %v241_v1 }
  0x9c   : > { %298 = vrot.lane.b32.xlu1 %v278_v11, %s752_s27  ;;  %294 = vrot.lane.b32.xlu2 %v272_v12, %s752_s27 }
  0xa2   : > { %v274_v15 = vpop.permute.xlu0 %273  ;;  %v280_v16 = vpop.permute.xlu1 %279 }
  0xa3   : > { %v275_v17 = vsel %vm269_vm0, %v274_v15, %v242_v3  ;;  %v281_v18 = vsel %vm269_vm0, %v280_v16, %v244_v4 }
  0xa4   : > { %304 = vrot.lane.b32.xlu1 %v287_v14, %s752_s27  ;;  %296 = vrot.lane.b32.xlu0 %v275_v17, %s752_s27 }
  0xa5   : > { %300 = vrot.lane.b32.xlu2 %v281_v18, %s752_s27 }
  0xaa   : > { %v289_v19 = vpop.permute.xlu0 %288  ;;  %v292_v22 = vpop.permute.xlu1 %291 }
  0xab   : > { %v290_v21 = vsel %vm269_vm0, %v289_v19, %v247_v7  ;;  %v293_v23 = vsel %vm269_vm0, %v292_v22, %v248_v6 }
  0xac   : > { %302 = vrot.lane.b32.xlu0 %v284_v20, %s752_s27 }
  0xad   : > { %306 = vrot.lane.b32.xlu2 %v290_v21, %s752_s27 }
  0xb4   : > { %308 = vrot.lane.b32.xlu0 %v293_v23, %s752_s27 }
  0xf6   : > { %v295_v24 = vpop.permute.xlu2 %294 }
  0xf7   : > { %v310_v25 = vsel %vm269_vm0, %v295_v24, %v241_v1 }
  0xf8   : > { %326 = vrot.lane.b32.xlu1 %v310_v25, %s753_s21 }
  0xff   : > { %v301_v26 = vpop.permute.xlu2 %300 }
 0x100   : > { %v313_v27 = vsel %vm269_vm0, %v301_v26, %v244_v4 }
 0x101   : > { %332 = vrot.lane.b32.xlu1 %v313_v27, %s753_s21 }
 0x107   : > { %v307_v28 = vpop.permute.xlu2 %306 }
 0x108   : > { %v316_v29 = vsel %vm269_vm0, %v307_v28, %v247_v7 }
 0x109   : > { %338 = vrot.lane.b32.xlu1 %v316_v29, %s753_s21 }
 0x10e   : > { %v299_v30 = vpop.permute.xlu1 %298 }
 0x10f   : > { %v312_v31 = vsel %vm269_vm0, %v299_v30, %v243_v0 }
 0x110   : > { %330 = vrot.lane.b32.xlu0 %v312_v31, %s753_s21 }
 0x116   : > { %v305_v32 = vpop.permute.xlu1 %304  ;;  %v297_v33 = vpop.permute.xlu0 %296 }
 0x117   : > { %v315_v34 = vsel %vm269_vm0, %v305_v32, %v246_v5  ;;  %v311_v35 = vsel %vm269_vm0, %v297_v33, %v242_v3 }
 0x118   : > { %336 = vrot.lane.b32.xlu0 %v315_v34, %s753_s21  ;;  %328 = vrot.lane.b32.xlu2 %v311_v35, %s753_s21 }
 0x11e   : > { %v303_v36 = vpop.permute.xlu0 %302 }
 0x11f   : > { %v314_v37 = vsel %vm269_vm0, %v303_v36, %v245_v2 }
 0x120   : > { %334 = vrot.lane.b32.xlu2 %v314_v37, %s753_s21 }
 0x126   : > { %v309_v38 = vpop.permute.xlu0 %308 }
 0x127   : > { %v317_v39 = vsel %vm269_vm0, %v309_v38, %v248_v6 }
 0x128   : > { %340 = vrot.lane.b32.xlu2 %v317_v39, %s753_s21 }
 0x16a   : > { %v327_v42 = vpop.permute.xlu1 %326 }
 0x16b   : > { %v350_v46 = vsel %vm251_vm1, %v327_v42, 0.0 }
 0x16c   : > { %513 = vst.msk [vmem:[%s917_s8 + $0x40] sm:$0xff] %vm260_vm2, %v350_v46 }
 0x172   : > { %v329_v59 = vpop.permute.xlu2 %328 }
 0x173   : > { %v351_v60 = vsel %vm251_vm1, %v329_v59, 0.0  ;;  %v333_v61 = vpop.permute.xlu1 %332 }
 0x174   : > { %514 = vst.msk [vmem:[%s917_s8 + $0x48] sm:$0xff] %vm260_vm2, %v351_v60  ;;  %v353_v63 = vsel %vm251_vm1, %v333_v61, 0.0 }
 0x175   : > { %516 = vst.msk [vmem:[%s917_s8 + $0x58] sm:$0xff] %vm260_vm2, %v353_v63 }
 0x17a   : > { %v335_v0 = vpop.permute.xlu2 %334 }
 0x17b   : > { %v354_v1 = vsel %vm251_vm1, %v335_v0, 0.0  ;;  %v339_v2 = vpop.permute.xlu1 %338 }
 0x17c   : > { %517 = vst.msk [vmem:[%s917_s8 + $0x60] sm:$0xff] %vm260_vm2, %v354_v1  ;;  %v356_v3 = vsel %vm251_vm1, %v339_v2, 0.0 }
 0x17d   : > { %519 = vst.msk [vmem:[%s917_s8 + $0x70] sm:$0xff] %vm260_vm2, %v356_v3 }
 0x182   : > { %v331_v4 = vpop.permute.xlu0 %330  ;;  %v341_v5 = vpop.permute.xlu2 %340 }
 0x183   : > { %v352_v6 = vsel %vm251_vm1, %v331_v4, 0.0  ;;  %v357_v7 = vsel %vm251_vm1, %v341_v5, 0.0 }
 0x184   : > { %515 = vst.msk [vmem:[%s917_s8 + $0x50] sm:$0xff] %vm260_vm2, %v352_v6 }
 0x185   : > { %520 = vst.msk [vmem:[%s917_s8 + $0x78] sm:$0xff] %vm260_vm2, %v357_v7 }
 0x18a   : > { %v337_v8 = vpop.permute.xlu0 %336 }
 0x18b   : > { %v355_v9 = vsel %vm251_vm1, %v337_v8, 0.0 }
 0x18c   : > { %518 = vst.msk [vmem:[%s917_s8 + $0x68] sm:$0xff] %vm260_vm2, %v355_v9 }
 0x18d   : > { %689 = shalt.err (!%p686_p13)
}
 0x18e   : > { %s754_s3 = smov 128   ;;  %s755_s27 = smov 8  }
 0x18f   : > { %533 = dma.vmem_to_hbm [thread:$0]  (%p822_p9), %s384_s28, 2048, %s386_s19, %s368_s12, %s754_s3, %s754_s3, %s755_s27  }
 0x190 PF: > { %s400_s21 = sand.u32 1, %s728_s9   ;;  %p543_p0 = pnand %p502_p12, %p829_p11 }
 0x191   : > { %s401_s6 = scalar_lea.sflag [#allocation4], %s400_s21 }
 0x192   : > { %p544_p1 = pneg %p543_p0 }
 0x194   : > { %723 = dma.done.wait (%p544_p1), %s401_s6, 2048  }
 0x195   : > { %725 = vsyncadd (%p544_p1), %s401_s6, 4294965248  ;;  %s21_s14 = sadd.s32 1, %s748_s14   ;;  %s1014_s9 = smov %s732_s10 }
 0x196   : > { %p18_p2 = scmp.ge.s32.totalorder %s21_s14, 4   ;;  %s1015_s10 = smov %s736_s11 }
 0x197   : > { %s1016_s11 = smov %s827_s23  ;;  %s1017_s12 = smov %s744_s13 }
 0x198   : > { %s1018_s13 = smov %s1020_s17  ;;  %20 = sbr.rel (!%p18_p2) target bundleno = 8 (0x8), region = 87 }
 0x19d   :  { %407 = vsyncpa [#allocation3], 1 }
 0x19e   :  { %409 = vsyncpa [#allocation3 + $0x1], 1 }
 0x19f   :  { %410 = vsyncpa [#allocation6], 1 }
 0x1a0   :  { %412 = vsyncpa [#allocation6 + $0x1], 1 }
 0x1a1   :  { %413 = vsyncpa [#allocation4], 1 }
 0x1a2   :  { %415 = vsyncpa [#allocation4 + $0x1], 1 }

</bundles_post_ra>
